<compile_context>
chip_gen: v5e
topology: v5e:2x2
jax: 0.10.0
libtpu: 0.0.40
codegen_flags: <defaults>
</compile_context>

<pallas_src>
import functools

import jax
import jax.numpy as jnp
from jax import lax
from jax.experimental import pallas as pl
from jax.experimental.pallas import tpu as pltpu


def _magloss_kernel(inv_ua2, cos_ref, cosm_t_ref, tgt_ref, xnorm_ref,
                    ce_ref, g_ref, onehot_ref, l_sc):
    k = pl.program_id(1)
    nk = pl.num_programs(1)
    TB, TC = cos_ref.shape

    @pl.when(k == 0)
    def _():
        l_sc[...] = jnp.zeros_like(l_sc)

    # one_hot mask for this class tile: lane index vs (target - tile offset).
    # The tile-offset subtraction happens on the (TB, 1) target operand so
    # only the compare touches a full (TB, TC) tile.
    lane = lax.broadcasted_iota(jnp.int32, (TB, TC), 1)
    tgt_local = tgt_ref[...] - k * TC                        # (TB, 1)
    mask = lane == tgt_local                                 # (TB, TC)

    onehot_ref[...] = mask.astype(onehot_ref.dtype)

    # output = one_hot * cos_theta_m + (1 - one_hot) * cos_theta.  Only the
    # target column of cos_theta_m is ever used; the wrapper gathered it to a
    # (B, 1) f32 operand, so this is a single select against the cos tile.
    cos = cos_ref[...].astype(jnp.float32)
    out = jnp.where(mask, cosm_t_ref[...], cos)              # (TB, TC) f32

    # |output| <= 1 (cosines, no scale in this forward), so exp never
    # overflows: plain f32 sum-exp across class tiles, no running max.
    l_sc[...] += jnp.sum(jnp.exp(out), axis=-1, keepdims=True)

    @pl.when(k == nk - 1)
    def _():
        # target logit is exactly the gathered cos_theta_m column.
        ce_ref[...] = jnp.log(l_sc[...]) - cosm_t_ref[...]   # per-sample CE
        xn = xnorm_ref[...]
        g_ref[...] = inv_ua2 * xn + pl.reciprocal(xn, approx=False)


def _tpu_info():
    try:
        return pltpu.get_tpu_info()
    except Exception:
        return None


def _vmem_capacity_bytes(info):
    if info is not None:
        v = getattr(info, "vmem_capacity_bytes", None)
        if v:
            return int(v)
    return 64 * 1024 * 1024              # conservative (v7x-sized) fallback


def _num_tensorcores(info):
    if info is not None:
        for name in ("num_cores", "core_count", "num_tensorcores"):
            v = getattr(info, name, None)
            if v:
                return int(v)
    return 1                             # v5e / v6e: one TC per chip


def _pick_tile(n, unit, max_tile):
    """Largest t <= max_tile with n % t == 0 and t % unit == 0 (else n)."""
    if n <= max_tile:
        return n
    t = (max_tile // unit) * unit
    while t >= unit:
        if n % t == 0:
            return t
        t -= unit
    return n        # no aligned divisor found; fall back to the full axis


def parallel_mag_loss(cos_theta, cos_theta_m, target, x_norm, *,
                      l_a=10.0, u_a=110.0, l_margin=0.45, u_margin=0.8,
                      scale=64.0, onehot_dtype=jnp.int8, tb=None, tc=None):
    """Returns (loss, loss_g, one_hot) with single-shard (world_size=1)
    semantics.  l_a / margins / scale only shape cos_theta_m upstream; they
    do not enter this forward pass.  one_hot is emitted as int8 by default
    (0/1 values are exact) to halve the HBM writeback; pass
    onehot_dtype=jnp.float32 if a float one-hot is required downstream."""
    del l_a, l_margin, u_margin, scale
    B, C = cos_theta.shape
    in_dtype = cos_theta.dtype

    # Only the target column of cos_theta_m is ever used; gather it up front
    # so the kernel never streams the dense (B, C) cos_theta_m from HBM.
    target2d = target.reshape(B, 1).astype(jnp.int32)
    cosm_tgt = jnp.take_along_axis(cos_theta_m, target2d, axis=1)
    cosm_tgt = cosm_tgt.astype(jnp.float32)                  # (B, 1)
    xnorm2d = x_norm.reshape(B, 1).astype(jnp.float32)

    # --- tile sizes, re-derived per chip generation -------------------------
    info = _tpu_info()
    vmem_cap = _vmem_capacity_bytes(info)
    num_cores = _num_tensorcores(info)
    vmem_limit = min(int(vmem_cap * 0.75), 100 * 1024 * 1024)

    in_b = jnp.dtype(in_dtype).itemsize
    oh_b = jnp.dtype(onehot_dtype).itemsize
    # Sublane requirement for the (tb, tc) blocks: int8 one_hot needs tb to be
    # a multiple of 32 (unless tb == B), bf16 inputs need 16, f32 needs 8.
    sublane = max(8, 8 * (4 // in_b), 8 * (4 // oh_b))

    if tb is None:
        tb_cap = 256
        if num_cores > 1:
            # Leave >= 2*num_cores batch steps so the "parallel" axis can be
            # sharded across TensorCores (v7x has 2 TCs per chip).
            tb_cap = min(tb_cap, max(sublane, B // (2 * num_cores)))
        tb = _pick_tile(B, sublane, tb_cap)
    if tc is None:
        # VMEM per (tb*tc) element: double-buffered cos input and one_hot
        # output, plus in-kernel intermediates (i32 iota, mask, f32 out/exp).
        bytes_per_elem = 2 * in_b + 2 * oh_b + 16
        budget = vmem_limit // 2             # headroom for small operands
        tc_cap = max(128, min(2048, budget // (bytes_per_elem * tb)))
        tc = _pick_tile(C, 128, tc_cap)
    assert B % tb == 0 and C % tc == 0, (B, C, tb, tc)

    grid = (B // tb, C // tc)
    kernel = functools.partial(_magloss_kernel, float(1.0 / (u_a * u_a)))

    ce, g, one_hot = pl.pallas_call(
        kernel,
        out_shape=(
            jax.ShapeDtypeStruct((B, 1), jnp.float32),    # per-sample CE
            jax.ShapeDtypeStruct((B, 1), jnp.float32),    # per-sample g
            jax.ShapeDtypeStruct((B, C), onehot_dtype),   # one_hot
        ),
        grid_spec=pltpu.PrefetchScalarGridSpec(
            num_scalar_prefetch=0,
            grid=grid,
            in_specs=[
                pl.BlockSpec((tb, tc), lambda i, k: (i, k)),   # cos_theta
                pl.BlockSpec((tb, 1), lambda i, k: (i, 0)),    # cos_m @ target
                pl.BlockSpec((tb, 1), lambda i, k: (i, 0)),    # target
                pl.BlockSpec((tb, 1), lambda i, k: (i, 0)),    # x_norm
            ],
            out_specs=(
                pl.BlockSpec((tb, 1), lambda i, k: (i, 0)),    # CE (resident over k)
                pl.BlockSpec((tb, 1), lambda i, k: (i, 0)),    # g  (resident over k)
                pl.BlockSpec((tb, tc), lambda i, k: (i, k)),   # one_hot
            ),
            scratch_shapes=[pltpu.VMEM((tb, 1), jnp.float32)],  # sum of exp
        ),
        compiler_params=pltpu.CompilerParams(
            dimension_semantics=("parallel", "arbitrary"),
            vmem_limit_bytes=vmem_limit),
    )(cos_theta, cosm_tgt, target2d, xnorm2d)

    # Tiny O(B) reductions outside the kernel; keeps the parallel batch axis
    # free of cross-core scalar accumulation.
    loss = jnp.mean(ce)
    loss_g = jnp.mean(g)
    return loss, loss_g, one_hot


if __name__ == "__main__":
    key = jax.random.PRNGKey(0)
    B, C = 32, 512                      # batch, (world_size * classes_per_shard)
    u_a, u_margin = 110.0, 0.8

    k1, k2, k3, k4 = jax.random.split(key, 4)
    cos_theta = jax.random.uniform(k1, (B, C), jnp.float32, -1.0, 1.0)
    cos_theta_m = jnp.cos(jnp.arccos(jnp.clip(cos_theta, -0.999, 0.999))
                          + u_margin * 0.5)
    target = jax.random.randint(k3, (B,), 0, C, jnp.int32)
    x_norm = jax.random.uniform(k4, (B, 1), jnp.float32, 10.0, u_a)

    # native bf16 logits (halves the HBM read traffic inside the kernel)
    cos_bf16 = cos_theta.astype(jnp.bfloat16)
    cosm_bf16 = cos_theta_m.astype(jnp.bfloat16)

    # explicit small tiles so the multi-step class-axis streaming path runs
    # (tb must be a multiple of 32 or equal B for the int8 one_hot output)
    loss, loss_g, one_hot = parallel_mag_loss(
        cos_bf16, cosm_bf16, target, x_norm, u_a=u_a, u_margin=u_margin,
        tb=32, tc=128)
    jax.block_until_ready((loss, loss_g, one_hot))

    # default (auto-derived) tiling path
    loss_d, loss_g_d, one_hot_d = parallel_mag_loss(
        cos_bf16, cosm_bf16, target, x_norm, u_a=u_a, u_margin=u_margin)
    jax.block_until_ready((loss_d, loss_g_d, one_hot_d))

    # plain-JAX reference (same f32 math on the bf16-quantized inputs)
    cos_f = cos_bf16.astype(jnp.float32)
    cosm_f = cosm_bf16.astype(jnp.float32)
    oh_ref = jax.nn.one_hot(target, C, dtype=jnp.float32)
    out_ref = oh_ref * cosm_f + (1.0 - oh_ref) * cos_f
    ce_ref = jnp.mean(jax.nn.logsumexp(out_ref, axis=-1)
                      - jnp.sum(out_ref * oh_ref, axis=-1))
    g_ref = jnp.mean(x_norm / u_a ** 2 + 1.0 / x_norm)

    assert jnp.allclose(loss, ce_ref, atol=1e-3), (loss, ce_ref)
    assert jnp.allclose(loss_g, g_ref, atol=1e-4), (loss_g, g_ref)
    assert jnp.allclose(one_hot.astype(jnp.float32), oh_ref), "one_hot mismatch"
    assert jnp.allclose(loss_d, ce_ref, atol=1e-3), (loss_d, ce_ref)
    assert jnp.allclose(loss_g_d, g_ref, atol=1e-4), (loss_g_d, g_ref)
    assert jnp.allclose(one_hot_d.astype(jnp.float32), oh_ref), "one_hot mismatch"

    print("KERNEL_OK")
</pallas_src>

<mosaic_0001>
module attributes {stable_mosaic.version = 11 : i64} {
  func.func @_magloss_kernel(%arg0: i32, %arg1: i32, %arg2: memref<32x128xbf16, #tpu.memory_space<vmem>>, %arg3: memref<32x1xf32, #tpu.memory_space<vmem>>, %arg4: memref<32x1xi32, #tpu.memory_space<vmem>>, %arg5: memref<32x1xf32, #tpu.memory_space<vmem>>, %arg6: memref<32x1xf32, #tpu.memory_space<vmem>>, %arg7: memref<32x1xf32, #tpu.memory_space<vmem>>, %arg8: memref<32x128xi8, #tpu.memory_space<vmem>>, %arg9: memref<32x1xf32, #tpu.memory_space<vmem>>) attributes {dimension_semantics = [#tpu.dimension_semantics<parallel>, #tpu.dimension_semantics<arbitrary>], iteration_bounds = array<i64: 1, 4>, scalar_prefetch = 0 : i64, scratch_operands = 1 : i64, tpu.core_type = #tpu.core_type<tc>, window_params = [{transform_indices = @transform_0, window_bounds = array<i64: 32, 128>}, {transform_indices = @transform_1, window_bounds = array<i64: 32, 1>}, {transform_indices = @transform_2, window_bounds = array<i64: 32, 1>}, {transform_indices = @transform_3, window_bounds = array<i64: 32, 1>}, {transform_indices = @transform_4, window_bounds = array<i64: 32, 1>}, {transform_indices = @transform_5, window_bounds = array<i64: 32, 1>}, {transform_indices = @transform_6, window_bounds = array<i64: 32, 128>}]} {
    %c0_i32 = arith.constant 0 : i32
    %0 = arith.cmpi eq, %arg1, %c0_i32 : i32
    %1 = arith.extui %0 : i1 to i32
    %c0_i32_0 = arith.constant 0 : i32
    %2 = arith.cmpi ne, %1, %c0_i32_0 : i32
    scf.if %2 {
      %cst_13 = arith.constant 0.000000e+00 : f32
      %27 = vector.broadcast %cst_13 : f32 to vector<32x1xf32>
      %c0_14 = arith.constant 0 : index
      %c0_15 = arith.constant 0 : index
      %28 = vector.load %arg9[%c0_14, %c0_15] : memref<32x1xf32, #tpu.memory_space<vmem>>, vector<32x1xf32>
      tpu.vector_store %arg9[%c0_14, %c0_15], %27 {strides = array<i32>} : memref<32x1xf32, #tpu.memory_space<vmem>>, vector<32x1xf32>,
    } else {
    }
    %3 = tpu.iota {dimensions = array<i32: 1>} : vector<32x128xi32>
    %c0 = arith.constant 0 : index
    %c0_1 = arith.constant 0 : index
    %4 = vector.load %arg4[%c0, %c0_1] : memref<32x1xi32, #tpu.memory_space<vmem>>, vector<32x1xi32>
    %c128_i32 = arith.constant 128 : i32
    %5 = arith.muli %arg1, %c128_i32 : i32
    %6 = vector.broadcast %5 : i32 to vector<32x1xi32>
    %7 = arith.subi %4, %6 : vector<32x1xi32>
    %8 = vector.broadcast %7 : vector<32x1xi32> to vector<32x128xi32>
    %9 = arith.cmpi eq, %3, %8 : vector<32x128xi32>
    %10 = arith.extui %9 : vector<32x128xi1> to vector<32x128xi8>
    %c0_2 = arith.constant 0 : index
    %c0_3 = arith.constant 0 : index
    %11 = vector.load %arg8[%c0_2, %c0_3] : memref<32x128xi8, #tpu.memory_space<vmem>>, vector<32x128xi8>
    tpu.vector_store %arg8[%c0_2, %c0_3], %10 {strides = array<i32>} : memref<32x128xi8, #tpu.memory_space<vmem>>, vector<32x128xi8>,
    %c0_4 = arith.constant 0 : index
    %c0_5 = arith.constant 0 : index
    %12 = vector.load %arg2[%c0_4, %c0_5] : memref<32x128xbf16, #tpu.memory_space<vmem>>, vector<32x128xbf16>
    %13 = arith.extf %12 : vector<32x128xbf16> to vector<32x128xf32>
    %c0_6 = arith.constant 0 : index
    %c0_7 = arith.constant 0 : index
    %14 = vector.load %arg3[%c0_6, %c0_7] : memref<32x1xf32, #tpu.memory_space<vmem>>, vector<32x1xf32>
    %15 = vector.shape_cast %14 : vector<32x1xf32> to vector<32x1xf32>
    %16 = vector.broadcast %15 : vector<32x1xf32> to vector<32x128xf32>
    %17 = arith.select %9, %16, %13 : vector<32x128xi1>, vector<32x128xf32>
    %c0_8 = arith.constant 0 : index
    %c0_9 = arith.constant 0 : index
    %18 = vector.load %arg9[%c0_8, %c0_9] : memref<32x1xf32, #tpu.memory_space<vmem>>, vector<32x1xf32>
    %19 = math.exp %17 : vector<32x128xf32>
    %cst = arith.constant dense<0.000000e+00> : vector<32xf32>
    %20 = vector.multi_reduction <add>, %19, %cst [1] : vector<32x128xf32> to vector<32xf32>
    %21 = vector.shape_cast %20 : vector<32xf32> to vector<32x1xf32>
    %22 = arith.addf %18, %21 : vector<32x1xf32>
    %c0_10 = arith.constant 0 : index
    %c0_11 = arith.constant 0 : index
    %23 = vector.load %arg9[%c0_10, %c0_11] : memref<32x1xf32, #tpu.memory_space<vmem>>, vector<32x1xf32>
    tpu.vector_store %arg9[%c0_10, %c0_11], %22 {strides = array<i32>} : memref<32x1xf32, #tpu.memory_space<vmem>>, vector<32x1xf32>,
    %c3_i32 = arith.constant 3 : i32
    %24 = arith.cmpi eq, %arg1, %c3_i32 : i32
    %25 = arith.extui %24 : i1 to i32
    %c0_i32_12 = arith.constant 0 : i32
    %26 = arith.cmpi ne, %25, %c0_i32_12 : i32
    scf.if %26 {
      %c0_13 = arith.constant 0 : index
      %c0_14 = arith.constant 0 : index
      %27 = vector.load %arg9[%c0_13, %c0_14] : memref<32x1xf32, #tpu.memory_space<vmem>>, vector<32x1xf32>
      %28 = math.log %27 : vector<32x1xf32>
      %c0_15 = arith.constant 0 : index
      %c0_16 = arith.constant 0 : index
      %29 = vector.load %arg3[%c0_15, %c0_16] : memref<32x1xf32, #tpu.memory_space<vmem>>, vector<32x1xf32>
      %30 = arith.subf %28, %29 : vector<32x1xf32>
      %c0_17 = arith.constant 0 : index
      %c0_18 = arith.constant 0 : index
      %31 = vector.load %arg6[%c0_17, %c0_18] : memref<32x1xf32, #tpu.memory_space<vmem>>, vector<32x1xf32>
      tpu.vector_store %arg6[%c0_17, %c0_18], %30 {strides = array<i32>} : memref<32x1xf32, #tpu.memory_space<vmem>>, vector<32x1xf32>,
      %c0_19 = arith.constant 0 : index
      %c0_20 = arith.constant 0 : index
      %32 = vector.load %arg5[%c0_19, %c0_20] : memref<32x1xf32, #tpu.memory_space<vmem>>, vector<32x1xf32>
      %cst_21 = arith.constant 8.26446266E-5 : f32
      %33 = vector.broadcast %cst_21 : f32 to vector<32x1xf32>
      %34 = arith.mulf %33, %32 : vector<32x1xf32>
      %35 = tpu.reciprocal %32 : vector<32x1xf32> -> vector<32x1xf32>
      %36 = arith.addf %34, %35 : vector<32x1xf32>
      %c0_22 = arith.constant 0 : index
      %c0_23 = arith.constant 0 : index
      %37 = vector.load %arg7[%c0_22, %c0_23] : memref<32x1xf32, #tpu.memory_space<vmem>>, vector<32x1xf32>
      tpu.vector_store %arg7[%c0_22, %c0_23], %36 {strides = array<i32>} : memref<32x1xf32, #tpu.memory_space<vmem>>, vector<32x1xf32>,
    } else {
    }
    return
  }
  func.func @transform_0(%arg0: i32, %arg1: i32) -> (i32, i32) {
    %c0_i32 = arith.constant 0 : i32
    return %arg0, %arg1 : i32, i32
  }
  func.func @transform_1(%arg0: i32, %arg1: i32) -> (i32, i32) {
    %c0_i32 = arith.constant 0 : i32
    %c0_i32_0 = arith.constant 0 : i32
    return %arg0, %c0_i32 : i32, i32
  }
  func.func @transform_2(%arg0: i32, %arg1: i32) -> (i32, i32) {
    %c0_i32 = arith.constant 0 : i32
    %c0_i32_0 = arith.constant 0 : i32
    return %arg0, %c0_i32 : i32, i32
  }
  func.func @transform_3(%arg0: i32, %arg1: i32) -> (i32, i32) {
    %c0_i32 = arith.constant 0 : i32
    %c0_i32_0 = arith.constant 0 : i32
    return %arg0, %c0_i32 : i32, i32
  }
  func.func @transform_4(%arg0: i32, %arg1: i32) -> (i32, i32) {
    %c0_i32 = arith.constant 0 : i32
    %c0_i32_0 = arith.constant 0 : i32
    return %arg0, %c0_i32 : i32, i32
  }
  func.func @transform_5(%arg0: i32, %arg1: i32) -> (i32, i32) {
    %c0_i32 = arith.constant 0 : i32
    %c0_i32_0 = arith.constant 0 : i32
    return %arg0, %c0_i32 : i32, i32
  }
  func.func @transform_6(%arg0: i32, %arg1: i32) -> (i32, i32) {
    %c0_i32 = arith.constant 0 : i32
    return %arg0, %arg1 : i32, i32
  }
}

</mosaic_0001>

<bundles_post_ra>
// kernel: tpu_custom_call.1
= control target key start
LH: loop header
LB: loop body
LE: loop exit
PB: predicated region body
PF: predicated region fallthrough
CT: control target
= control target key end

     0   :  { %s1338_s0 = inlined_call_operand.vmem [shape: bf16[32,512], index: 0, kind: input, shape index: {}]   ;;  %s1339_s1 = inlined_call_operand.vmem [shape: f32[32,1], index: 1, kind: input, shape index: {}]   ;;  %s1340_s2 = inlined_call_operand.vmem [shape: s32[32,1], index: 2, kind: input, shape index: {}]   ;;  %s1341_s3 = inlined_call_operand.vmem [shape: f32[32,1], index: 3, kind: input, shape index: {}]   ;;  %s1342_s4 = inlined_call_operand.vmem [shape: f32[32,1], index: 4, kind: output, shape index: {0}]   ;;  %s1343_s5 = inlined_call_operand.vmem [shape: f32[32,1], index: 5, kind: output, shape index: {1}]   ;;  %s1344_s6 = inlined_call_operand.hbm [shape: s8[32,512], index: 6, kind: output, shape index: {2}]  }
   0x1   :  { %1345 = sst [smem:[#allocation7_spill]] %s1338_s0 }
   0x2   :  { %12 = vsyncpa [#allocation5], 0 }
   0x3   :  { %14 = vsyncpa [#allocation5 + $0x1], 0  ;;  %s1065_s21 = smov 0   ;;  %s1067_s22 = smov 0  }
   0x4   :  { %s1069_s23 = smov 0   ;;  %s1071_s24 = smov 0  }
   0x5   :  { %s1073_s25 = smov 0   ;;  %s1075_s26 = smov 0  }
   0x6 LB: > { %s832_s27 = sadd.s32 4294967295, %s1026_s26   ;;  %s833_s28 = sadd.s32 4294967294, %s1026_s26   ;;  %s1026_s26 = sphi %s1075_s26, %s20_s26   ;;  %s1022_s25 = sphi %s1073_s25, %s1363_s25   ;;  %s1018_s24 = sphi %s1071_s24, %s1362_s24   ;;  %s1014_s23 = sphi %s1069_s23, %s1361_s23   ;;  %s1010_s22 = sphi %s1067_s22, %s1360_s22   ;;  %s1006_s21 = sphi %s1065_s21, %s1359_s21  }
   0x7   : > { %s29_s29 = sadd.s32 1, %s1022_s25  ;;  %s41_s30 = sadd.s32 1, %s1014_s23 }
   0x8   : > { %p30_p0 = scmp.ge.s32.totalorder %s29_s29, 4  ;;  %p48_p1 = scmp.ne.s32.totalorder %s1014_s23, %s1010_s22 }
   0x9   : > { %p49_p2 = scmp.eq.s32.totalorder %s1026_s26, 0  ;;  %p210_p3 = scmp.eq.s32.totalorder %s832_s27, 3 }
   0xa   : > { %s1365_s29 = smov (%p30_p0, %s29_s29), 0  ;;  %p215_p6 = scmp.ne.s32.totalorder %s1010_s22, %s1006_s21 }
   0xb   : > { %p50_p4 = por %p49_p2, %p48_p1  ;;  %p1104_p5 = por %p210_p3, %p48_p1 }
   0xc   : > { %s37_s8 = ssub.s32 %s1022_s25, %s1365_s29  ;;  %p216_p8 = scmp.eq.s32.totalorder %s833_s28, 3 }
   0xd   : > { %p39_p7 = scmp.eq.s32.totalorder %s37_s8, 0  ;;  %p838_p10 = scmp.ge.s32.totalorder %s1026_s26, 4 }
   0xe   : > { %p1115_p9 = por %p216_p8, %p215_p6 }
   0xf   : > { %s1113_s9 = scalar_select %p39_p7, %s1014_s23, %s41_s30  }
  0x10   : > { %259 = sbr.rel (%p838_p10) target bundleno = 35 (0x23), region = 28 }
  0x15   : > { %262 = sbr.rel (!%p50_p4) target bundleno = 35 (0x23), region = 32  ;;  %s264_s11 = sand.u32 (%p50_p4), 1, %s1014_s23  }
  0x16   : > { %s840_s12 = sshll.u32 (%p50_p4), %s1022_s25, 2  ;;  %s839_s13 = sshll.u32 (%p50_p4), %s264_s11, 4 }
  0x17   : > { %s1348_s0 = sld [smem:[#allocation7_spill]] (%p50_p4)  ;;  %s266_s17 = scalar_lea.vmem (%p50_p4), [#allocation3], %s839_s13 }
  0x1d   : > { %s271_s16 = scalar_lea.vmem %s1348_s0, %s840_s12 }
  0x1e   : > { %v288_v0 = vld [vmem:[%s271_s16] sm:$0xf]  ;;  %v290_v1 = vld [vmem:[%s271_s16 + $0x10] sm:$0xf] }
  0x1f   : > { %289 = vst [vmem:[%s266_s17] sm:$0xf] %v288_v0  ;;  %v292_v2 = vld [vmem:[%s271_s16 + $0x20] sm:$0xf]  ;;  %v294_v3 = vld [vmem:[%s271_s16 + $0x30] sm:$0xf] }
  0x20   : > { %291 = vst [vmem:[%s266_s17 + $0x4] sm:$0xf] %v290_v1 }
  0x21   : > { %293 = vst [vmem:[%s266_s17 + $0x8] sm:$0xf] %v292_v2 }
  0x22   : > { %295 = vst [vmem:[%s266_s17 + $0xc] sm:$0xf] %v294_v3 }
  0x23 PF: > { %p841_p11 = scmp.ge.s32.totalorder %s1026_s26, 1  ;;  %p326_p12 = scmp.lt.s32.totalorder %s1026_s26, 5 }
  0x25   : > { %p327_p13 = pnand %p841_p11, %p326_p12 }
  0x26   : > { %s1128_s18 = sand.u32 (!%p327_p13), 1, %s1010_s22   ;;  %p844_p0 = scmp.ne.s32.totalorder (!%p327_p13), %s1018_s24, 0 }
  0x27   : > { %330 = sbr.rel (%p327_p13) target bundleno = 366 (0x16e), region = 73  ;;  %s842_s19 = sshll.u32 (!%p327_p13), %s1128_s18, 4 }
  0x28   : > { %s843_s20 = sshll.u32 (!%p327_p13), %s1128_s18, 3  ;;  %s1132_s27 = scalar_lea.vmem (!%p327_p13), [#allocation3], %s842_s19 }
  0x29   : > { %s1134_s28 = scalar_lea.vmem (!%p327_p13), [#allocation4], %s843_s20 }
  0x2c   : > { %423 = sbr.rel (%p844_p0) target bundleno = 54 (0x36), region = 81 }
  0x31   : > { %vm424_vm0 = vcmask 7168   ;;  %v1028_v4 = vmov 0.0  }
  0x32   : > { %425 = vst.msk [vmem:[#allocation2] sm:$0xff] %vm424_vm0, %v1028_v4 }
  0x33   : > { %426 = vst.msk [vmem:[#allocation2 + $0x8] sm:$0xff] %vm424_vm0, %v1028_v4 }
  0x34   : > { %427 = vst.msk [vmem:[#allocation2 + $0x10] sm:$0xff] %vm424_vm0, %v1028_v4 }
  0x35   : > { %428 = vst.msk [vmem:[#allocation2 + $0x18] sm:$0xff] %vm424_vm0, %v1028_v4 }
  0x36 PF: > { %v433_v5 = vld [vmem:[%s1340_s2 + $0x10] sm:$0xff]  ;;  %s845_s11 = sshll.u32 %s1018_s24, 7  ;;  %v431_v6 = vld [vmem:[%s1340_s2] sm:$0xff]  ;;  %v1029_v7 = vmov 0   ;;  %v434_v12 = vld [vmem:[%s1340_s2 + $0x18] sm:$0xff]  ;;  %v429_v19 = vlaneseq  ;;  %vm525_vm8 = vcmask 7168  }
  0x37   : > { %922 = vset.pattern.permute.xlu1 %v1029_v7  ;;  %921 = vset.pattern.permute.xlu0 %v1029_v7  ;;  %v436_v8 = vstv %s845_s11  ;;  %v473_v11 = vld [vmem:[%s1339_s1] sm:$0xff]  ;;  %v432_v13 = vld [vmem:[%s1340_s2 + $0x8] sm:$0xff]  ;;  %v476_v17 = vld [vmem:[%s1339_s1 + $0x18] sm:$0xff]  ;;  %p846_p1 = scmp.ne.s32.totalorder %s1018_s24, 3 }
  0x38   : > { %v439_v9 = vsub.s32 %v433_v5, %v436_v8  ;;  %v437_v10 = vsub.s32 %v431_v6, %v436_v8  ;;  %923 = vset.pattern.permute.xlu2 %v1029_v7  ;;  %v440_v14 = vsub.s32 %v434_v12, %v436_v8  ;;  %v438_v15 = vsub.s32 %v432_v13, %v436_v8  ;;  %v474_v16 = vld [vmem:[%s1339_s1 + $0x8] sm:$0xff]  ;;  %v475_v18 = vld [vmem:[%s1339_s1 + $0x10] sm:$0xff] }
  0x39   : > { %479 = vperm.xlu2 %923, %v473_v11   ;;  %v856_v20 = vld [vmem:[%s1132_s27] sm:$0xff]   ;;  %v430_v22 = vand.u32 127, %v429_v19  ;;  %v863_v33 = vld [vmem:[%s1132_s27 + $0x8] sm:$0xff]  }
  0x3a   : > { %448 = vperm.xlu1 %922, %v439_v9   ;;  %442 = vperm.xlu0 %921, %v437_v10   ;;  %v857_v23 = vunpack.c.l.bf16 %v856_v20  ;;  %v858_v28 = vunpack.c.h.bf16 %v856_v20  ;;  %v862_v39 = vunpack.c.h.bf16 %v863_v33  ;;  %v861_v40 = vunpack.c.l.bf16 %v863_v33  ;;  %v501_v51 = vld [vmem:[#allocation2] sm:$0xff]  ;;  %v502_v54 = vld [vmem:[#allocation2 + $0x8] sm:$0xff] }
  0x3b   : > { %v503_v58 = vld [vmem:[#allocation2 + $0x10] sm:$0xff] }
  0x3c   : > { %v504_v57 = vld [vmem:[#allocation2 + $0x18] sm:$0xff] }
  0x41   : > { %484 = vperm.xlu2 %923, %v474_v16  }
  0x42   : > { %451 = vperm.xlu1 %922, %v440_v14   ;;  %445 = vperm.xlu0 %921, %v438_v15  }
  0x4a   : > { %494 = vperm.xlu1 %922, %v476_v17   ;;  %489 = vperm.xlu0 %921, %v475_v18  }
  0x93   : > { %v480_v21 = vpop.permute.xlu2 %479 }
  0x9b   : > { %v485_v29 = vpop.permute.xlu2 %484 }
  0xac   : > { %v449_v24 = vpop.permute.xlu1 %448  ;;  %v443_v25 = vpop.permute.xlu0 %442 }
  0xad   : > { %vm453_vm1 = vcmp.eq.s32.totalorder %v430_v22, %v443_v25  ;;  %vm455_vm2 = vcmp.eq.s32.totalorder %v430_v22, %v449_v24 }
  0xae   : > { %v497_v26 = vsel %vm453_vm1, %v480_v21, %v857_v23 }
  0xaf   : > { %v505_v27 = vmul.f32 1.442695, %v497_v26 }
  0xb1   : > { %924 = vpow2.f32 %v505_v27 }
  0xb4   : > { %v452_v30 = vpop.permute.xlu1 %451  ;;  %v446_v31 = vpop.permute.xlu0 %445 }
  0xb5   : > { %vm456_vm3 = vcmp.eq.s32.totalorder %v430_v22, %v452_v30  ;;  %vm454_vm4 = vcmp.eq.s32.totalorder %v430_v22, %v446_v31 }
  0xb6   : > { %vm458_vm5 = vmpackc.low %vm456_vm3, %vm455_vm2  ;;  %v498_v32 = vsel %vm454_vm4, %v485_v29, %v858_v28 }
  0xb7   : > { %v925_v34 = vpop.eup %924  ;;  %v460_v35 = vsel %vm458_vm5, 16711935, %v1029_v7  ;;  %vm457_vm6 = vmpackc.low %vm454_vm4, %vm453_vm1  ;;  %v507_v36 = vmul.f32 1.442695, %v498_v32 }
  0xb8   : > { %v459_v37 = vsel %vm457_vm6, 16711935, %v1029_v7  ;;  %513 = vadd.xlane.f32.xlu2 %v925_v34 }
  0xb9   : > { %v461_v38 = vpack.c.b8 %v460_v35, %v459_v37  ;;  %926 = vpow2.f32 %v507_v36 }
  0xbb   : > { %vm462_vm7 = vnez %v461_v38 }
  0xbc   : > { %v463_v41 = vsel %vm462_vm7, 16843009, %v1029_v7  ;;  %v495_v42 = vpop.permute.xlu1 %494  ;;  %v490_v43 = vpop.permute.xlu0 %489 }
  0xbd   : > { %464 = vst [vmem:[%s1134_s28] sm:$0xff] %v463_v41  ;;  %v500_v44 = vsel %vm456_vm3, %v495_v42, %v862_v39  ;;  %v499_v45 = vsel %vm455_vm2, %v490_v43, %v861_v40 }
  0xbe   : > { %v511_v46 = vmul.f32 1.442695, %v500_v44  ;;  %v509_v47 = vmul.f32 1.442695, %v499_v45 }
  0xbf   : > { %v927_v48 = vpop.eup %926 }
  0xc0   : > { %928 = vpow2.f32 %v511_v46  ;;  %515 = vadd.xlane.f32.xlu0 %v927_v48 }
  0xc1   : > { %930 = vpow2.f32 %v509_v47 }
  0xc6   : > { %v929_v49 = vpop.eup %928 }
  0xc7   : > { %v931_v50 = vpop.eup %930  ;;  %519 = vadd.xlane.f32.xlu2 %v929_v49 }
  0xc8   : > { %517 = vadd.xlane.f32.xlu1 %v931_v50 }
 0x12b   : > { %v514_v52 = vpop.xlane.xlu2 %513 }
 0x12c   : > { %v521_v53 = vadd.f32 %v514_v52, %v501_v51 }
 0x12e   : > { %526 = vst.msk [vmem:[#allocation2] sm:$0xff] %vm525_vm8, %v521_v53 }
 0x133   : > { %v516_v55 = vpop.xlane.xlu0 %515 }
 0x134   : > { %v522_v56 = vadd.f32 %v516_v55, %v502_v54 }
 0x136   : > { %527 = vst.msk [vmem:[#allocation2 + $0x8] sm:$0xff] %vm525_vm8, %v522_v56 }
 0x13a   : > { %v520_v59 = vpop.xlane.xlu2 %519  ;;  %533 = sbr.rel (%p846_p1) target bundleno = 351 (0x15f), region = 85 }
 0x13b   : > { %v518_v60 = vpop.xlane.xlu1 %517  ;;  %v524_v61 = vadd.f32 %v520_v59, %v504_v57 }
 0x13c   : > { %v523_v62 = vadd.f32 %v518_v60, %v503_v58 }
 0x13d   : > { %529 = vst.msk [vmem:[#allocation2 + $0x18] sm:$0xff] %vm525_vm8, %v524_v61 }
 0x13e   : > { %528 = vst.msk [vmem:[#allocation2 + $0x10] sm:$0xff] %vm525_vm8, %v523_v62 }
 0x13f   : > { %v534_v63 = vld [vmem:[#allocation2] sm:$0xff]  ;;  %v535_v0 = vld [vmem:[#allocation2 + $0x8] sm:$0xff]  ;;  %v1187_v5 = vld [vmem:[%s1341_s3 + $0x10] sm:$0xff] }
 0x140   : > { %932 = vlog2.f32 %v534_v63  ;;  %v558_v3 = vld [vmem:[%s1341_s3] sm:$0xff]  ;;  %v1182_v4 = vld [vmem:[%s1341_s3 + $0x8] sm:$0xff]  ;;  %v1192_v6 = vld [vmem:[%s1341_s3 + $0x18] sm:$0xff]  ;;  %v564_v33 = vmul.f32 8.264463e-05, %v1187_v5  ;;  %vm599_vm12 = vweird.f32 %v1187_v5  ;;  %v605_v41 = vand.u32 2147483648, %v1187_v5 }
 0x141   : > { %934 = vlog2.f32 %v535_v0  ;;  %v575_v7 = vand.u32 2147483647, %v558_v3  ;;  %v546_v9 = vld [vmem:[%s1339_s1] sm:$0xff]  ;;  %v547_v12 = vld [vmem:[%s1339_s1 + $0x8] sm:$0xff]  ;;  %v548_v13 = vld [vmem:[%s1339_s1 + $0x10] sm:$0xff]  ;;  %v577_v14 = vand.u32 2147483648, %v558_v3  ;;  %vm571_vm9 = vweird.f32 %v558_v3 }
 0x142   : > { %v1206_v17 = vmul.f32 8.264463e-05, %v558_v3  ;;  %v1209_v18 = vmul.f32 8.264463e-05, %v1182_v4  ;;  %v549_v22 = vld [vmem:[%s1339_s1 + $0x18] sm:$0xff]  ;;  %vm585_vm11 = vweird.f32 %v1182_v4  ;;  %v591_v28 = vand.u32 2147483648, %v1182_v4 }
 0x143   : > { %vm1214_vm10 = vcmp.eq.f32.partialorder %v575_v7, 8.507059e+37  ;;  %v589_v27 = vand.u32 2147483647, %v1182_v4  ;;  %v578_v32 = vor.u32 1.1754944e-38, %v577_v14  ;;  %v603_v37 = vand.u32 2147483647, %v1187_v5 }
 0x144   : > { %v537_v2 = vld [vmem:[#allocation2 + $0x18] sm:$0xff]  ;;  %vm613_vm15 = vweird.f32 %v1192_v6  ;;  %v619_v46 = vand.u32 2147483648, %v1192_v6  ;;  %v617_v50 = vand.u32 2147483647, %v1192_v6  ;;  %v592_v54 = vor.u32 1.1754944e-38, %v591_v28 }
 0x145   : > { %v536_v1 = vld [vmem:[#allocation2 + $0x10] sm:$0xff]  ;;  %vm1258_vm4 = vcmp.eq.f32.partialorder %v589_v27, 8.507059e+37  ;;  %v606_v58 = vor.u32 1.1754944e-38, %v605_v41  ;;  %v565_v59 = vmul.f32 8.264463e-05, %v1192_v6  ;;  %vm604_vm6 = vcmp.eq.f32.partialorder %v603_v37, 8.507059e+37 }
 0x146   : > { %936 = vlog2.f32 %v536_v1  ;;  %v933_v8 = vpop.eup %932  ;;  %v620_v63 = vor.u32 1.1754944e-38, %v619_v46 }
 0x147   : > { %938 = vlog2.f32 %v537_v2  ;;  %v935_v10 = vpop.eup %934  ;;  %v539_v11 = vmul.f32 0.6931472, %v933_v8 }
 0x148   : > { %940 = vrcp.f32 %v558_v3  ;;  %v541_v16 = vmul.f32 0.6931472, %v935_v10 }
 0x149   : > { %942 = vrcp.f32 %v1182_v4  ;;  %v550_v20 = vsub.f32 %v539_v11, %v546_v9 }
 0x14a   : > { %944 = vrcp.f32 %v1187_v5  ;;  %v551_v25 = vsub.f32 %v541_v16, %v547_v12 }
 0x14b   : > { %946 = vrcp.f32 %v1192_v6  ;;  %554 = vst.msk [vmem:[%s1342_s4] sm:$0xff] %vm525_vm8, %v550_v20 }
 0x14c   : > { %v937_v15 = vpop.eup %936  ;;  %555 = vst.msk [vmem:[%s1342_s4 + $0x8] sm:$0xff] %vm525_vm8, %v551_v25 }
 0x14d   : > { %v939_v19 = vpop.eup %938  ;;  %v543_v21 = vmul.f32 0.6931472, %v937_v15 }
 0x14e   : > { %v941_v24 = vpop.eup %940  ;;  %v545_v26 = vmul.f32 0.6931472, %v939_v19 }
 0x14f   : > { %v943_v29 = vpop.eup %942  ;;  %v552_v30 = vsub.f32 %v543_v21, %v548_v13  ;;  %v567_v31 = vmul.f32 %v941_v24, %v558_v3  ;;  %vm572_vm13 = vweird.f32 %v941_v24 }
 0x150   : > { %v945_v34 = vpop.eup %944  ;;  %v553_v35 = vsub.f32 %v545_v26, %v549_v22  ;;  %v581_v36 = vmul.f32 %v943_v29, %v1182_v4  ;;  %vm586_vm14 = vweird.f32 %v943_v29  ;;  %vm1247_vm1 = vmor %vm571_vm9, %vm572_vm13  ;;  %vm618_vm9 = vcmp.eq.f32.partialorder %v617_v50, 8.507059e+37 }
 0x151   : > { %v947_v38 = vpop.eup %946  ;;  %556 = vst.msk [vmem:[%s1342_s4 + $0x10] sm:$0xff] %vm525_vm8, %v552_v30  ;;  %v568_v39 = vsub.f32 1.0, %v567_v31  ;;  %v595_v40 = vmul.f32 %v945_v34, %v1187_v5  ;;  %vm600_vm0 = vweird.f32 %v945_v34  ;;  %vm1254_vm3 = vmor %vm585_vm11, %vm586_vm14 }
 0x152   : > { %557 = vst.msk [vmem:[%s1342_s4 + $0x18] sm:$0xff] %vm525_vm8, %v553_v35  ;;  %v582_v42 = vsub.f32 1.0, %v581_v36  ;;  %v609_v43 = vmul.f32 %v947_v38, %v1192_v6  ;;  %vm614_vm2 = vweird.f32 %v947_v38  ;;  %vm1264_vm5 = vmor %vm599_vm12, %vm600_vm0 }
 0x153   : > { %v569_v44 = vmul.f32 %v941_v24, %v568_v39  ;;  %v596_v45 = vsub.f32 1.0, %v595_v40  ;;  %vm615_vm7 = vmor %vm613_vm15, %vm614_vm2 }
 0x154   : > { %v583_v48 = vmul.f32 %v943_v29, %v582_v42  ;;  %v610_v49 = vsub.f32 1.0, %v609_v43 }
 0x155   : > { %v570_v51 = vadd.f32 %v941_v24, %v569_v44  ;;  %v597_v55 = vmul.f32 %v945_v34, %v596_v45 }
 0x156   : > { %v584_v56 = vadd.f32 %v943_v29, %v583_v48  ;;  %v611_v60 = vmul.f32 %v947_v38, %v610_v49 }
 0x157   : > { %v574_v61 = vsel %vm1247_vm1, %v941_v24, %v570_v51  ;;  %v598_v62 = vadd.f32 %v945_v34, %v597_v55 }
 0x158   : > { %v579_v0 = vsel %vm1214_vm10, %v578_v32, %v574_v61  ;;  %v588_v1 = vsel %vm1254_vm3, %v943_v29, %v584_v56  ;;  %v612_v2 = vadd.f32 %v947_v38, %v611_v60 }
 0x159   : > { %v622_v3 = vadd.f32 %v579_v0, %v1206_v17  ;;  %v593_v4 = vsel %vm1258_vm4, %v592_v54, %v588_v1  ;;  %v602_v5 = vsel %vm1264_vm5, %v945_v34, %v598_v62 }
 0x15a   : > { %v623_v6 = vadd.f32 %v593_v4, %v1209_v18  ;;  %v607_v7 = vsel %vm604_vm6, %v606_v58, %v602_v5  ;;  %v616_v8 = vsel %vm615_vm7, %v947_v38, %v612_v2 }
 0x15b   : > { %626 = vst.msk [vmem:[%s1343_s5] sm:$0xff] %vm525_vm8, %v622_v3  ;;  %v624_v9 = vadd.f32 %v607_v7, %v564_v33  ;;  %v621_v10 = vsel %vm618_vm9, %v620_v63, %v616_v8 }
 0x15c   : > { %627 = vst.msk [vmem:[%s1343_s5 + $0x8] sm:$0xff] %vm525_vm8, %v623_v6  ;;  %v625_v11 = vadd.f32 %v621_v10, %v565_v59 }
 0x15d   : > { %628 = vst.msk [vmem:[%s1343_s5 + $0x10] sm:$0xff] %vm525_vm8, %v624_v9 }
 0x15e   : > { %629 = vst.msk [vmem:[%s1343_s5 + $0x18] sm:$0xff] %vm525_vm8, %v625_v11 }
 0x15f PF: > { %s850_s11 = sshll.u32 %s1018_s24, 3  ;;  %s663_s27 = sshll.u32 %s1134_s28, 4  ;;  %s664_s27 = int_to_ptr.vmem [resolvable:$true] %s663_s27 }
 0x160   : > { %s661_s14 = scalar_lea.hbm %s1344_s6, %s850_s11  ;;  %s641_s16 = scalar_lea.sflag [#allocation5], %s1128_s18 }
 0x161   : > { %s665_s15 = sshll.u32 %s661_s14, 4  ;;  %s968_s24 = scalar_lea.hbm %s1344_s6, 32  ;;  %s666_s15 = int_to_ptr.hbm [resolvable:$true] %s665_s15 }
 0x162   : > { %s962_s17 = sshra.s32 %s666_s15, 4  ;;  %s963_s17 = int_to_ptr.hbm [resolvable:$true] %s962_s17 }
 0x163   : > { %s964_s19 = scalar_lea.hbm %s963_s17, 8  ;;  %p969_p6 = scmp.lt.s32.totalorder %s963_s17, %s1344_s6 }
 0x164   : > { %p965_p2 = scmp.ne.s32.totalorder %s963_s17, %s964_s19  ;;  %p970_p7 = scmp.lt.s32.totalorder %s968_s24, %s964_s19 }
 0x166   : > { %p966_p3 = pnand %p965_p2, %p1104_p5  ;;  %p971_p8 = por %p970_p7, %p969_p6 }
 0x168   : > { %p967_p4 = pneg %p966_p3 }
 0x16a   : > { %p972_p10 = pnand %p971_p8, %p967_p4 }
 0x16c   : > { %975 = shalt.err (!%p972_p10)
}
 0x16d   : > { %864 = dma.vmem_to_hbm [thread:$0]  (%p1104_p5), %s664_s27, 128, %s666_s15, %s641_s16  }
 0x16e PF: > { %p870_p11 = scmp.ge.s32.totalorder %s1026_s26, 2  ;;  %s693_s18 = sand.u32 1, %s1006_s21  }
 0x16f   : > { %s694_s28 = scalar_lea.sflag [#allocation5], %s693_s18 }
 0x170   : > { %p867_p12 = pnand %p870_p11, %p1115_p9 }
 0x172   : > { %p868_p13 = pneg %p867_p12 }
 0x174   : > { %1001 = dma.done.wait (%p868_p13), %s694_s28, 128  }
 0x175   : > { %1003 = vsyncadd (%p868_p13), %s694_s28, 4294967168  ;;  %s20_s26 = sadd.s32 1, %s1026_s26   ;;  %s1359_s21 = smov %s1010_s22 }
 0x176   : > { %p17_p0 = scmp.ge.s32.totalorder %s20_s26, 6   ;;  %s1360_s22 = smov %s1014_s23 }
 0x177   : > { %s1361_s23 = smov %s1113_s9  ;;  %s1362_s24 = smov %s1022_s25 }
 0x178   : > { %s1363_s25 = smov %s1365_s29  ;;  %19 = sbr.rel (!%p17_p0) target bundleno = 6 (0x6), region = 158 }
 0x17d   :  { %700 = vsyncpa [#allocation5], 1 }
 0x17e   :  { %702 = vsyncpa [#allocation5 + $0x1], 1 }

</bundles_post_ra>
